<compile_context>
chip_gen: v7x
topology: tpu7x:2x2x1
jax: 0.10.0
libtpu: 0.0.40
codegen_flags: <defaults>
</compile_context>

<pallas_src>
import functools
import math

import jax
import jax.numpy as jnp
from jax import lax
from jax.experimental import pallas as pl
from jax.experimental.pallas import tpu as pltpu


# ----------------------------- kernels ------------------------------------- #

def _kv_proj_kernel(k_ref, v_ref, wk_ref, bk_ref, wv_ref, bv_ref,
                    kproj_ref, vproj_ref, *, num_heads):
    # k: (m, Ks), v: (m, Vs)
    # wk: (H, d, Ks), bk: (H, 1, d), wv: (H, d, Vs), bv: (H, 1, d)
    # outputs: kproj/vproj (H, m, d)   (head-major, so kernel 2 never lane-slices)
    k = k_ref[...]
    v = v_ref[...]
    cdims = (((1,), (1,)), ((), ()))
    for h in range(num_heads):
        kh = lax.dot_general(k, wk_ref[h], cdims,
                             preferred_element_type=jnp.float32) + bk_ref[h]
        vh = lax.dot_general(v, wv_ref[h], cdims,
                             preferred_element_type=jnp.float32) + bv_ref[h]
        kproj_ref[h] = kh.astype(kproj_ref.dtype)
        vproj_ref[h] = vh.astype(vproj_ref.dtype)


def _attn_kernel(q_ref, kproj_ref, vproj_ref, wq_ref, bq_ref, wo_ref, bo_ref,
                 gamma_ref, beta_ref, out_ref, *, num_heads, head_size):
    # q:     (tile, Qs)          — this grid step's query rows
    # kproj: (H, m, d), vproj: (H, m, d)
    # wq:    (H, d, Qs), bq: (H, 1, d)
    # wo:    (H, O, d),  bo/gamma/beta: (1, O)
    q = q_ref[...]                                   # native dtype for the MXU
    tile = q.shape[0]
    out_dim = out_ref.shape[-1]
    scale = 1.0 / math.sqrt(head_size)
    cdims = (((1,), (1,)), ((), ()))

    out_acc = jnp.zeros((tile, out_dim), jnp.float32)
    for h in range(num_heads):
        # Q projection for this head: (tile, d), f32 accumulation.
        qh = lax.dot_general(q, wq_ref[h], cdims,
                             preferred_element_type=jnp.float32) + bq_ref[h]
        kh = kproj_ref[h].astype(jnp.float32)        # (m, d)
        vh = vproj_ref[h]                            # (m, d)

        # scores (tile, m) = qh @ kh^T / sqrt(d)  — contracting dims, no transpose.
        s = lax.dot_general(qh, kh, cdims,
                            preferred_element_type=jnp.float32) * scale
        # TODO(synk): attention_mask path not wired here — the reference formula
        # (1 - mask) * float('-inf') NaNs kept positions; a jnp.where(mask == 0,
        # -inf, s) at this line implements the intended semantics if needed.

        # row-wise stable softmax (all f32).
        mx = jnp.max(s, axis=-1, keepdims=True)
        e = jnp.exp(s - mx)
        p = e * pl.reciprocal(jnp.sum(e, axis=-1, keepdims=True), approx=False)

        # attention output for this head: (tile, d)
        ah = jnp.dot(p.astype(vh.dtype), vh, preferred_element_type=jnp.float32)

        # fold the output projection per head into a lane-dense (tile, O) accumulator:
        # out += ah @ Wo[:, h*d:(h+1)*d]^T
        out_acc = out_acc + lax.dot_general(ah, wo_ref[h].astype(jnp.float32),
                                            cdims,
                                            preferred_element_type=jnp.float32)

    out_acc = out_acc + bo_ref[...].astype(jnp.float32)

    # LayerNorm over the feature dim (biased variance, eps=1e-5, PyTorch defaults).
    mu = jnp.mean(out_acc, axis=-1, keepdims=True)
    xc = out_acc - mu
    var = jnp.mean(xc * xc, axis=-1, keepdims=True)
    normed = xc * lax.rsqrt(var + 1e-5)
    normed = normed * gamma_ref[...].astype(jnp.float32) \
             + beta_ref[...].astype(jnp.float32)

    # residual connection with the original (unprojected) queries.
    out_ref[...] = (normed + q.astype(jnp.float32)).astype(out_ref.dtype)


# ----------------------------- wrapper -------------------------------------- #

def mha_with_residual(q, k, v, params, *, num_heads, attention_mask=None,
                      tile_n=512):
    """q: (n, query_size), k: (m, key_size), v: (m, value_size) -> (n, output_size)."""
    if attention_mask is not None:
        # TODO(synk): masked path not implemented (see kernel comment).
        raise NotImplementedError("attention_mask is not supported by this kernel")

    wq, bq, wk, bk, wv, bv, wo, bo, gamma, beta = params
    A, Qs = wq.shape
    Ks = wk.shape[1]
    Vs = wv.shape[1]
    O = wo.shape[0]
    d = A // num_heads
    n = q.shape[0]
    m = k.shape[0]
    assert d * num_heads == A
    assert O == Qs, "residual connection requires output_size == query_size"

    # One-time weight re-layout in plain XLA: head-major, no in-kernel transposes.
    wq3 = wq.reshape(num_heads, d, Qs)
    wk3 = wk.reshape(num_heads, d, Ks)
    wv3 = wv.reshape(num_heads, d, Vs)
    bq3 = bq.reshape(num_heads, 1, d)
    bk3 = bk.reshape(num_heads, 1, d)
    bv3 = bv.reshape(num_heads, 1, d)
    wo3 = wo.reshape(O, num_heads, d).transpose(1, 0, 2)   # (H, O, d)
    bo2 = bo.reshape(1, O)
    gamma2 = gamma.reshape(1, O)
    beta2 = beta.reshape(1, O)

    # ---- kernel 1: project K and V once, head-major (H, m, d) ---- #
    kproj, vproj = pl.pallas_call(
        functools.partial(_kv_proj_kernel, num_heads=num_heads),
        out_shape=(jax.ShapeDtypeStruct((num_heads, m, d), k.dtype),
                   jax.ShapeDtypeStruct((num_heads, m, d), v.dtype)),
        in_specs=[
            pl.BlockSpec((m, Ks), lambda: (0, 0)),
            pl.BlockSpec((m, Vs), lambda: (0, 0)),
            pl.BlockSpec((num_heads, d, Ks), lambda: (0, 0, 0)),
            pl.BlockSpec((num_heads, 1, d), lambda: (0, 0, 0)),
            pl.BlockSpec((num_heads, d, Vs), lambda: (0, 0, 0)),
            pl.BlockSpec((num_heads, 1, d), lambda: (0, 0, 0)),
        ],
        out_specs=(pl.BlockSpec((num_heads, m, d), lambda: (0, 0, 0)),
                   pl.BlockSpec((num_heads, m, d), lambda: (0, 0, 0))),
    )(k, v, wk3, bk3, wv3, bv3)

    # ---- kernel 2: fused Q-proj + attention + output-proj + LN + residual ---- #
    tile = n if n <= tile_n else tile_n      # tile_n divisible by 8; partial last
    grid = (pl.cdiv(n, tile),)               # tile is clipped on write by Pallas
    out = pl.pallas_call(
        functools.partial(_attn_kernel, num_heads=num_heads, head_size=d),
        out_shape=jax.ShapeDtypeStruct((n, O), q.dtype),
        grid=grid,
        in_specs=[
            pl.BlockSpec((tile, Qs), lambda i: (i, 0)),
            pl.BlockSpec((num_heads, m, d), lambda i: (0, 0, 0)),
            pl.BlockSpec((num_heads, m, d), lambda i: (0, 0, 0)),
            pl.BlockSpec((num_heads, d, Qs), lambda i: (0, 0, 0)),
            pl.BlockSpec((num_heads, 1, d), lambda i: (0, 0, 0)),
            pl.BlockSpec((num_heads, O, d), lambda i: (0, 0, 0)),
            pl.BlockSpec((1, O), lambda i: (0, 0)),
            pl.BlockSpec((1, O), lambda i: (0, 0)),
            pl.BlockSpec((1, O), lambda i: (0, 0)),
        ],
        out_specs=pl.BlockSpec((tile, O), lambda i: (i, 0)),
        compiler_params=pltpu.CompilerParams(
            dimension_semantics=("parallel",)),
    )(q, kproj, vproj, wq3, bq3, wo3, bo2, gamma2, beta2)
    return out


# ----------------------------- params / reference --------------------------- #

def init_params(key, query_size, key_size, value_size, attention_size,
                output_size, dtype=jnp.float32):
    """Mirror PyTorch nn.Linear / nn.LayerNorm default inits (shapes match)."""
    keys = jax.random.split(key, 8)

    def linear(kw, kb, in_f, out_f):
        bound = 1.0 / math.sqrt(in_f)
        w = jax.random.uniform(kw, (out_f, in_f), dtype, -bound, bound)
        b = jax.random.uniform(kb, (out_f,), dtype, -bound, bound)
        return w, b

    wq, bq = linear(keys[0], keys[1], query_size, attention_size)
    wk, bk = linear(keys[2], keys[3], key_size, attention_size)
    wv, bv = linear(keys[4], keys[5], value_size, attention_size)
    wo, bo = linear(keys[6], keys[7], attention_size, output_size)
    gamma = jnp.ones((output_size,), dtype)
    beta = jnp.zeros((output_size,), dtype)
    return wq, bq, wk, bk, wv, bv, wo, bo, gamma, beta


def _reference(q, k, v, params, *, num_heads):
    """Pure-JAX mirror of the PyTorch forward (2-D path, no mask)."""
    wq, bq, wk, bk, wv, bv, wo, bo, gamma, beta = params
    A = wq.shape[0]
    d = A // num_heads
    n, m = q.shape[0], k.shape[0]

    Q = q @ wq.T + bq
    K = k @ wk.T + bk
    V = v @ wv.T + bv
    Qh = Q.reshape(n, num_heads, d).transpose(1, 0, 2)
    Kh = K.reshape(m, num_heads, d).transpose(1, 0, 2)
    Vh = V.reshape(m, num_heads, d).transpose(1, 0, 2)

    s = jnp.einsum('hnd,hmd->hnm', Qh, Kh) / jnp.sqrt(jnp.float32(d))
    p = jax.nn.softmax(s, axis=-1)
    ao = jnp.einsum('hnm,hmd->hnd', p, Vh)
    ao = ao.transpose(1, 0, 2).reshape(n, A)

    out = ao @ wo.T + bo
    mu = out.mean(-1, keepdims=True)
    var = out.var(-1, keepdims=True)
    normed = (out - mu) / jnp.sqrt(var + 1e-5) * gamma + beta
    return normed + q


# ----------------------------- demo ------------------------------------------ #

if __name__ == "__main__":
    key = jax.random.PRNGKey(0)
    n, m = 8, 8
    query_size = key_size = value_size = 32
    attention_size, output_size, num_heads = 32, 32, 4

    kq, kk, kv, kp = jax.random.split(key, 4)
    q = jax.random.normal(kq, (n, query_size), jnp.float32)
    k = jax.random.normal(kk, (m, key_size), jnp.float32)
    v = jax.random.normal(kv, (m, value_size), jnp.float32)
    params = init_params(kp, query_size, key_size, value_size,
                         attention_size, output_size)

    out = mha_with_residual(q, k, v, params, num_heads=num_heads)
    out = jax.block_until_ready(out)

    ref = _reference(q, k, v, params, num_heads=num_heads)
    assert out.shape == (n, output_size)
    assert jnp.allclose(out, ref, atol=1e-4, rtol=1e-4), (out, ref)

    print("KERNEL_OK")
</pallas_src>

<mosaic_0001>
module attributes {stable_mosaic.version = 11 : i64} {
  func.func @_kv_proj_kernel(%arg0: memref<8x32xf32, #tpu.memory_space<vmem>>, %arg1: memref<8x32xf32, #tpu.memory_space<vmem>>, %arg2: memref<4x8x32xf32, #tpu.memory_space<vmem>>, %arg3: memref<4x1x8xf32, #tpu.memory_space<vmem>>, %arg4: memref<4x8x32xf32, #tpu.memory_space<vmem>>, %arg5: memref<4x1x8xf32, #tpu.memory_space<vmem>>, %arg6: memref<4x8x8xf32, #tpu.memory_space<vmem>>, %arg7: memref<4x8x8xf32, #tpu.memory_space<vmem>>) attributes {dimension_semantics = [], scalar_prefetch = 0 : i64, scratch_operands = 0 : i64, tpu.core_type = #tpu.core_type<tc>} {
    %c0 = arith.constant 0 : index
    %c0_0 = arith.constant 0 : index
    %0 = vector.load %arg0[%c0, %c0_0] : memref<8x32xf32, #tpu.memory_space<vmem>>, vector<8x32xf32>
    %c0_1 = arith.constant 0 : index
    %c0_2 = arith.constant 0 : index
    %1 = vector.load %arg1[%c0_1, %c0_2] : memref<8x32xf32, #tpu.memory_space<vmem>>, vector<8x32xf32>
    %c0_3 = arith.constant 0 : index
    %c0_4 = arith.constant 0 : index
    %c0_5 = arith.constant 0 : index
    %2 = vector.load %arg2[%c0_3, %c0_4, %c0_5] : memref<4x8x32xf32, #tpu.memory_space<vmem>>, vector<1x8x32xf32>
    %3 = vector.shape_cast %2 : vector<1x8x32xf32> to vector<8x32xf32>
    %cst = arith.constant dense<0.000000e+00> : vector<8x8xf32>
    %4 = tpu.matmul %0, %3, %cst {dimension_numbers = #tpu.dot_dimension_numbers<[1], [1], [0], [0], [0, 0, 1, 0], [], []>} : vector<8x32xf32>, vector<8x32xf32>, vector<8x8xf32> -> vector<8x8xf32>
    %c0_6 = arith.constant 0 : index
    %c0_7 = arith.constant 0 : index
    %c0_8 = arith.constant 0 : index
    %5 = vector.load %arg3[%c0_6, %c0_7, %c0_8] : memref<4x1x8xf32, #tpu.memory_space<vmem>>, vector<1x1x8xf32>
    %6 = vector.shape_cast %5 : vector<1x1x8xf32> to vector<1x8xf32>
    %7 = vector.broadcast %6 : vector<1x8xf32> to vector<8x8xf32>
    %8 = arith.addf %4, %7 : vector<8x8xf32>
    %c0_9 = arith.constant 0 : index
    %c0_10 = arith.constant 0 : index
    %c0_11 = arith.constant 0 : index
    %9 = vector.load %arg4[%c0_9, %c0_10, %c0_11] : memref<4x8x32xf32, #tpu.memory_space<vmem>>, vector<1x8x32xf32>
    %10 = vector.shape_cast %9 : vector<1x8x32xf32> to vector<8x32xf32>
    %cst_12 = arith.constant dense<0.000000e+00> : vector<8x8xf32>
    %11 = tpu.matmul %1, %10, %cst_12 {dimension_numbers = #tpu.dot_dimension_numbers<[1], [1], [0], [0], [0, 0, 1, 0], [], []>} : vector<8x32xf32>, vector<8x32xf32>, vector<8x8xf32> -> vector<8x8xf32>
    %c0_13 = arith.constant 0 : index
    %c0_14 = arith.constant 0 : index
    %c0_15 = arith.constant 0 : index
    %12 = vector.load %arg5[%c0_13, %c0_14, %c0_15] : memref<4x1x8xf32, #tpu.memory_space<vmem>>, vector<1x1x8xf32>
    %13 = vector.shape_cast %12 : vector<1x1x8xf32> to vector<1x8xf32>
    %14 = vector.broadcast %13 : vector<1x8xf32> to vector<8x8xf32>
    %15 = arith.addf %11, %14 : vector<8x8xf32>
    %c0_16 = arith.constant 0 : index
    %c0_17 = arith.constant 0 : index
    %c0_18 = arith.constant 0 : index
    %16 = vector.load %arg6[%c0_16, %c0_17, %c0_18] : memref<4x8x8xf32, #tpu.memory_space<vmem>>, vector<1x8x8xf32>
    %17 = vector.shape_cast %16 : vector<1x8x8xf32> to vector<8x8xf32>
    %18 = vector.shape_cast %8 : vector<8x8xf32> to vector<1x8x8xf32>
    tpu.vector_store %arg6[%c0_16, %c0_17, %c0_18], %18 {strides = array<i32>} : memref<4x8x8xf32, #tpu.memory_space<vmem>>, vector<1x8x8xf32>,
    %c0_19 = arith.constant 0 : index
    %c0_20 = arith.constant 0 : index
    %c0_21 = arith.constant 0 : index
    %19 = vector.load %arg7[%c0_19, %c0_20, %c0_21] : memref<4x8x8xf32, #tpu.memory_space<vmem>>, vector<1x8x8xf32>
    %20 = vector.shape_cast %19 : vector<1x8x8xf32> to vector<8x8xf32>
    %21 = vector.shape_cast %15 : vector<8x8xf32> to vector<1x8x8xf32>
    tpu.vector_store %arg7[%c0_19, %c0_20, %c0_21], %21 {strides = array<i32>} : memref<4x8x8xf32, #tpu.memory_space<vmem>>, vector<1x8x8xf32>,
    %c1 = arith.constant 1 : index
    %c0_22 = arith.constant 0 : index
    %c0_23 = arith.constant 0 : index
    %22 = vector.load %arg2[%c1, %c0_22, %c0_23] : memref<4x8x32xf32, #tpu.memory_space<vmem>>, vector<1x8x32xf32>
    %23 = vector.shape_cast %22 : vector<1x8x32xf32> to vector<8x32xf32>
    %cst_24 = arith.constant dense<0.000000e+00> : vector<8x8xf32>
    %24 = tpu.matmul %0, %23, %cst_24 {dimension_numbers = #tpu.dot_dimension_numbers<[1], [1], [0], [0], [0, 0, 1, 0], [], []>} : vector<8x32xf32>, vector<8x32xf32>, vector<8x8xf32> -> vector<8x8xf32>
    %c1_25 = arith.constant 1 : index
    %c0_26 = arith.constant 0 : index
    %c0_27 = arith.constant 0 : index
    %25 = vector.load %arg3[%c1_25, %c0_26, %c0_27] : memref<4x1x8xf32, #tpu.memory_space<vmem>>, vector<1x1x8xf32>
    %26 = vector.shape_cast %25 : vector<1x1x8xf32> to vector<1x8xf32>
    %27 = vector.broadcast %26 : vector<1x8xf32> to vector<8x8xf32>
    %28 = arith.addf %24, %27 : vector<8x8xf32>
    %c1_28 = arith.constant 1 : index
    %c0_29 = arith.constant 0 : index
    %c0_30 = arith.constant 0 : index
    %29 = vector.load %arg4[%c1_28, %c0_29, %c0_30] : memref<4x8x32xf32, #tpu.memory_space<vmem>>, vector<1x8x32xf32>
    %30 = vector.shape_cast %29 : vector<1x8x32xf32> to vector<8x32xf32>
    %cst_31 = arith.constant dense<0.000000e+00> : vector<8x8xf32>
    %31 = tpu.matmul %1, %30, %cst_31 {dimension_numbers = #tpu.dot_dimension_numbers<[1], [1], [0], [0], [0, 0, 1, 0], [], []>} : vector<8x32xf32>, vector<8x32xf32>, vector<8x8xf32> -> vector<8x8xf32>
    %c1_32 = arith.constant 1 : index
    %c0_33 = arith.constant 0 : index
    %c0_34 = arith.constant 0 : index
    %32 = vector.load %arg5[%c1_32, %c0_33, %c0_34] : memref<4x1x8xf32, #tpu.memory_space<vmem>>, vector<1x1x8xf32>
    %33 = vector.shape_cast %32 : vector<1x1x8xf32> to vector<1x8xf32>
    %34 = vector.broadcast %33 : vector<1x8xf32> to vector<8x8xf32>
    %35 = arith.addf %31, %34 : vector<8x8xf32>
    %c1_35 = arith.constant 1 : index
    %c0_36 = arith.constant 0 : index
    %c0_37 = arith.constant 0 : index
    %36 = vector.load %arg6[%c1_35, %c0_36, %c0_37] : memref<4x8x8xf32, #tpu.memory_space<vmem>>, vector<1x8x8xf32>
    %37 = vector.shape_cast %36 : vector<1x8x8xf32> to vector<8x8xf32>
    %38 = vector.shape_cast %28 : vector<8x8xf32> to vector<1x8x8xf32>
    tpu.vector_store %arg6[%c1_35, %c0_36, %c0_37], %38 {strides = array<i32>} : memref<4x8x8xf32, #tpu.memory_space<vmem>>, vector<1x8x8xf32>,
    %c1_38 = arith.constant 1 : index
    %c0_39 = arith.constant 0 : index
    %c0_40 = arith.constant 0 : index
    %39 = vector.load %arg7[%c1_38, %c0_39, %c0_40] : memref<4x8x8xf32, #tpu.memory_space<vmem>>, vector<1x8x8xf32>
    %40 = vector.shape_cast %39 : vector<1x8x8xf32> to vector<8x8xf32>
    %41 = vector.shape_cast %35 : vector<8x8xf32> to vector<1x8x8xf32>
    tpu.vector_store %arg7[%c1_38, %c0_39, %c0_40], %41 {strides = array<i32>} : memref<4x8x8xf32, #tpu.memory_space<vmem>>, vector<1x8x8xf32>,
    %c2 = arith.constant 2 : index
    %c0_41 = arith.constant 0 : index
    %c0_42 = arith.constant 0 : index
    %42 = vector.load %arg2[%c2, %c0_41, %c0_42] : memref<4x8x32xf32, #tpu.memory_space<vmem>>, vector<1x8x32xf32>
    %43 = vector.shape_cast %42 : vector<1x8x32xf32> to vector<8x32xf32>
    %cst_43 = arith.constant dense<0.000000e+00> : vector<8x8xf32>
    %44 = tpu.matmul %0, %43, %cst_43 {dimension_numbers = #tpu.dot_dimension_numbers<[1], [1], [0], [0], [0, 0, 1, 0], [], []>} : vector<8x32xf32>, vector<8x32xf32>, vector<8x8xf32> -> vector<8x8xf32>
    %c2_44 = arith.constant 2 : index
    %c0_45 = arith.constant 0 : index
    %c0_46 = arith.constant 0 : index
    %45 = vector.load %arg3[%c2_44, %c0_45, %c0_46] : memref<4x1x8xf32, #tpu.memory_space<vmem>>, vector<1x1x8xf32>
    %46 = vector.shape_cast %45 : vector<1x1x8xf32> to vector<1x8xf32>
    %47 = vector.broadcast %46 : vector<1x8xf32> to vector<8x8xf32>
    %48 = arith.addf %44, %47 : vector<8x8xf32>
    %c2_47 = arith.constant 2 : index
    %c0_48 = arith.constant 0 : index
    %c0_49 = arith.constant 0 : index
    %49 = vector.load %arg4[%c2_47, %c0_48, %c0_49] : memref<4x8x32xf32, #tpu.memory_space<vmem>>, vector<1x8x32xf32>
    %50 = vector.shape_cast %49 : vector<1x8x32xf32> to vector<8x32xf32>
    %cst_50 = arith.constant dense<0.000000e+00> : vector<8x8xf32>
    %51 = tpu.matmul %1, %50, %cst_50 {dimension_numbers = #tpu.dot_dimension_numbers<[1], [1], [0], [0], [0, 0, 1, 0], [], []>} : vector<8x32xf32>, vector<8x32xf32>, vector<8x8xf32> -> vector<8x8xf32>
    %c2_51 = arith.constant 2 : index
    %c0_52 = arith.constant 0 : index
    %c0_53 = arith.constant 0 : index
    %52 = vector.load %arg5[%c2_51, %c0_52, %c0_53] : memref<4x1x8xf32, #tpu.memory_space<vmem>>, vector<1x1x8xf32>
    %53 = vector.shape_cast %52 : vector<1x1x8xf32> to vector<1x8xf32>
    %54 = vector.broadcast %53 : vector<1x8xf32> to vector<8x8xf32>
    %55 = arith.addf %51, %54 : vector<8x8xf32>
    %c2_54 = arith.constant 2 : index
    %c0_55 = arith.constant 0 : index
    %c0_56 = arith.constant 0 : index
    %56 = vector.load %arg6[%c2_54, %c0_55, %c0_56] : memref<4x8x8xf32, #tpu.memory_space<vmem>>, vector<1x8x8xf32>
    %57 = vector.shape_cast %56 : vector<1x8x8xf32> to vector<8x8xf32>
    %58 = vector.shape_cast %48 : vector<8x8xf32> to vector<1x8x8xf32>
    tpu.vector_store %arg6[%c2_54, %c0_55, %c0_56], %58 {strides = array<i32>} : memref<4x8x8xf32, #tpu.memory_space<vmem>>, vector<1x8x8xf32>,
    %c2_57 = arith.constant 2 : index
    %c0_58 = arith.constant 0 : index
    %c0_59 = arith.constant 0 : index
    %59 = vector.load %arg7[%c2_57, %c0_58, %c0_59] : memref<4x8x8xf32, #tpu.memory_space<vmem>>, vector<1x8x8xf32>
    %60 = vector.shape_cast %59 : vector<1x8x8xf32> to vector<8x8xf32>
    %61 = vector.shape_cast %55 : vector<8x8xf32> to vector<1x8x8xf32>
    tpu.vector_store %arg7[%c2_57, %c0_58, %c0_59], %61 {strides = array<i32>} : memref<4x8x8xf32, #tpu.memory_space<vmem>>, vector<1x8x8xf32>,
    %c3 = arith.constant 3 : index
    %c0_60 = arith.constant 0 : index
    %c0_61 = arith.constant 0 : index
    %62 = vector.load %arg2[%c3, %c0_60, %c0_61] : memref<4x8x32xf32, #tpu.memory_space<vmem>>, vector<1x8x32xf32>
    %63 = vector.shape_cast %62 : vector<1x8x32xf32> to vector<8x32xf32>
    %cst_62 = arith.constant dense<0.000000e+00> : vector<8x8xf32>
    %64 = tpu.matmul %0, %63, %cst_62 {dimension_numbers = #tpu.dot_dimension_numbers<[1], [1], [0], [0], [0, 0, 1, 0], [], []>} : vector<8x32xf32>, vector<8x32xf32>, vector<8x8xf32> -> vector<8x8xf32>
    %c3_63 = arith.constant 3 : index
    %c0_64 = arith.constant 0 : index
    %c0_65 = arith.constant 0 : index
    %65 = vector.load %arg3[%c3_63, %c0_64, %c0_65] : memref<4x1x8xf32, #tpu.memory_space<vmem>>, vector<1x1x8xf32>
    %66 = vector.shape_cast %65 : vector<1x1x8xf32> to vector<1x8xf32>
    %67 = vector.broadcast %66 : vector<1x8xf32> to vector<8x8xf32>
    %68 = arith.addf %64, %67 : vector<8x8xf32>
    %c3_66 = arith.constant 3 : index
    %c0_67 = arith.constant 0 : index
    %c0_68 = arith.constant 0 : index
    %69 = vector.load %arg4[%c3_66, %c0_67, %c0_68] : memref<4x8x32xf32, #tpu.memory_space<vmem>>, vector<1x8x32xf32>
    %70 = vector.shape_cast %69 : vector<1x8x32xf32> to vector<8x32xf32>
    %cst_69 = arith.constant dense<0.000000e+00> : vector<8x8xf32>
    %71 = tpu.matmul %1, %70, %cst_69 {dimension_numbers = #tpu.dot_dimension_numbers<[1], [1], [0], [0], [0, 0, 1, 0], [], []>} : vector<8x32xf32>, vector<8x32xf32>, vector<8x8xf32> -> vector<8x8xf32>
    %c3_70 = arith.constant 3 : index
    %c0_71 = arith.constant 0 : index
    %c0_72 = arith.constant 0 : index
    %72 = vector.load %arg5[%c3_70, %c0_71, %c0_72] : memref<4x1x8xf32, #tpu.memory_space<vmem>>, vector<1x1x8xf32>
    %73 = vector.shape_cast %72 : vector<1x1x8xf32> to vector<1x8xf32>
    %74 = vector.broadcast %73 : vector<1x8xf32> to vector<8x8xf32>
    %75 = arith.addf %71, %74 : vector<8x8xf32>
    %c3_73 = arith.constant 3 : index
    %c0_74 = arith.constant 0 : index
    %c0_75 = arith.constant 0 : index
    %76 = vector.load %arg6[%c3_73, %c0_74, %c0_75] : memref<4x8x8xf32, #tpu.memory_space<vmem>>, vector<1x8x8xf32>
    %77 = vector.shape_cast %76 : vector<1x8x8xf32> to vector<8x8xf32>
    %78 = vector.shape_cast %68 : vector<8x8xf32> to vector<1x8x8xf32>
    tpu.vector_store %arg6[%c3_73, %c0_74, %c0_75], %78 {strides = array<i32>} : memref<4x8x8xf32, #tpu.memory_space<vmem>>, vector<1x8x8xf32>,
    %c3_76 = arith.constant 3 : index
    %c0_77 = arith.constant 0 : index
    %c0_78 = arith.constant 0 : index
    %79 = vector.load %arg7[%c3_76, %c0_77, %c0_78] : memref<4x8x8xf32, #tpu.memory_space<vmem>>, vector<1x8x8xf32>
    %80 = vector.shape_cast %79 : vector<1x8x8xf32> to vector<8x8xf32>
    %81 = vector.shape_cast %75 : vector<8x8xf32> to vector<1x8x8xf32>
    tpu.vector_store %arg7[%c3_76, %c0_77, %c0_78], %81 {strides = array<i32>} : memref<4x8x8xf32, #tpu.memory_space<vmem>>, vector<1x8x8xf32>,
    return
  }
}

</mosaic_0001>

<bundles_post_ra>
// kernel: tpu_custom_call.1
= control target key start
LH: loop header
LB: loop body
LE: loop exit
PB: predicated region body
PF: predicated region fallthrough
CT: control target
= control target key end

     0   :  { %13 = vsyncpa [#allocation3], 0  ;;  %s1232_s0 = inlined_call_operand.hbm [shape: f32[8,32], index: 0, kind: input, shape index: {}]   ;;  %s1233_s1 = inlined_call_operand.hbm [shape: f32[8,32], index: 1, kind: input, shape index: {}]   ;;  %s1234_s2 = inlined_call_operand.hbm [shape: f32[4,8,32], index: 2, kind: input, shape index: {}]   ;;  %s1235_s3 = inlined_call_operand.vmem [shape: f32[4,1,8], index: 3, kind: input, shape index: {}]   ;;  %s1236_s4 = inlined_call_operand.hbm [shape: f32[4,8,32], index: 4, kind: input, shape index: {}]   ;;  %s1237_s5 = inlined_call_operand.vmem [shape: f32[4,1,8], index: 5, kind: input, shape index: {}]   ;;  %s1238_s6 = inlined_call_operand.hbm [shape: f32[4,8,8], index: 6, kind: output, shape index: {0}]   ;;  %s1239_s7 = inlined_call_operand.hbm [shape: f32[4,8,8], index: 7, kind: output, shape index: {1}]  }
   0x1   :  { %14 = vsyncpa [#allocation6], 0 }
   0x2   :  { %15 = vsyncpa [#allocation9], 0 }
   0x3   :  { %16 = vsyncpa [#allocation4], 0 }
   0x4   :  { %17 = vsyncpa [#allocation12], 0  ;;  %s1035_s24 = smov [#allocation5]   ;;  %s1036_s26 = smov [#allocation2]  }
   0x5   :  { %s34_s25 = sshll.u32 %s1035_s24, 4  ;;  %s24_s27 = sshll.u32 %s1036_s26, 4  ;;  %s35_s25 = int_to_ptr.vmem [resolvable:$true] %s34_s25  ;;  %s25_s27 = int_to_ptr.vmem [resolvable:$true] %s24_s27 }
   0x6   :  { %s893_s30 = scalar_lea.hbm %s1233_s1, 128 }
   0x7   :  { %p894_p0 = scmp.ne.s32.totalorder %s1233_s1, %s893_s30  ;;  %p897_p1 = scmp.lt.u32.totalorder %s893_s30, %s1233_s1 }
   0x9   :  { %p899_p2 = pnand %p897_p1, %p894_p0 }
   0xb   :  { %902 = shalt.err (!%p899_p2)
}
   0xc   :  { %s903_s12 = scalar_lea.vmem %s35_s25, 128  ;;  %p908_p4 = scmp.lt.s32.totalorder %s35_s25, %s35_s25 }
   0xd   :  { %p904_p3 = scmp.ne.s32.totalorder %s35_s25, %s903_s12  ;;  %p909_p5 = scmp.lt.s32.totalorder %s903_s12, %s903_s12 }
   0xf   :  { %p910_p6 = por %p909_p5, %p908_p4 }
  0x11   :  { %p911_p7 = pnand %p910_p6, %p904_p3 }
  0x13   :  { %914 = shalt.err (!%p911_p7)
}
  0x14   :  { %37 = dma.hbm_to_vmem [thread:$0]  %s1233_s1, 128, %s35_s25, [#allocation6]  }
  0x15   :  { %s915_s17 = scalar_lea.hbm %s1232_s0, 128 }
  0x16   :  { %p916_p8 = scmp.ne.s32.totalorder %s1232_s0, %s915_s17  ;;  %p919_p9 = scmp.lt.u32.totalorder %s915_s17, %s1232_s0 }
  0x18   :  { %p921_p10 = pnand %p919_p9, %p916_p8 }
  0x1a   :  { %924 = shalt.err (!%p921_p10)
}
  0x1b   :  { %s925_s22 = scalar_lea.vmem %s25_s27, 128  ;;  %p930_p12 = scmp.lt.s32.totalorder %s25_s27, %s25_s27 }
  0x1c   :  { %p926_p11 = scmp.ne.s32.totalorder %s25_s27, %s925_s22  ;;  %p931_p13 = scmp.lt.s32.totalorder %s925_s22, %s925_s22 }
  0x1e   :  { %p932_p0 = por %p931_p13, %p930_p12 }
  0x20   :  { %p933_p1 = pnand %p932_p0, %p926_p11 }
  0x22   :  { %936 = shalt.err (!%p933_p1)
}
  0x23   :  { %27 = dma.hbm_to_vmem [thread:$0]  %s1232_s0, 128, %s25_s27, [#allocation3]  }
  0x24   :  { %s1037_s24 = smov [#allocation7]   ;;  %s937_s29 = scalar_lea.hbm %s1234_s2, 512 }
  0x25   :  { %s43_s25 = sshll.u32 %s1037_s24, 4  ;;  %p938_p2 = scmp.ne.s32.totalorder %s1234_s2, %s937_s29  ;;  %s44_s25 = int_to_ptr.vmem [resolvable:$true] %s43_s25 }
  0x26   :  { %p941_p3 = scmp.lt.u32.totalorder %s937_s29, %s1234_s2 }
  0x28   :  { %p943_p4 = pnand %p941_p3, %p938_p2 }
  0x2a   :  { %946 = shalt.err (!%p943_p4)
}
  0x2b   :  { %s947_s11 = scalar_lea.vmem %s44_s25, 512  ;;  %p952_p6 = scmp.lt.s32.totalorder %s44_s25, %s44_s25 }
  0x2c   :  { %p948_p5 = scmp.ne.s32.totalorder %s44_s25, %s947_s11  ;;  %p953_p7 = scmp.lt.s32.totalorder %s947_s11, %s947_s11 }
  0x2e   :  { %p954_p8 = por %p953_p7, %p952_p6 }
  0x30   :  { %p955_p9 = pnand %p954_p8, %p948_p5 }
  0x32   :  { %958 = shalt.err (!%p955_p9)
}
  0x33   :  { %s1038_s0 = smov 128   ;;  %s1039_s27 = smov 8  }
  0x34   :  { %49 = dma.hbm_to_vmem [thread:$0]  %s1234_s2, 512, %s44_s25, [#allocation6], %s1038_s0, %s1038_s0, %s1039_s27  }
  0x35   :  { %s1040_s14 = smov [#allocation8]   ;;  %s959_s18 = scalar_lea.hbm %s1236_s4, 512 }
  0x36   :  { %s57_s15 = sshll.u32 %s1040_s14, 4  ;;  %p960_p10 = scmp.ne.s32.totalorder %s1236_s4, %s959_s18  ;;  %s58_s15 = int_to_ptr.vmem [resolvable:$true] %s57_s15 }
  0x37   :  { %p963_p11 = scmp.lt.u32.totalorder %s959_s18, %s1236_s4 }
  0x39   :  { %p965_p12 = pnand %p963_p11, %p960_p10 }
  0x3b   :  { %968 = shalt.err (!%p965_p12)
}
  0x3c   :  { %s969_s1 = scalar_lea.vmem %s58_s15, 512  ;;  %p974_p0 = scmp.lt.s32.totalorder %s58_s15, %s58_s15 }
  0x3d   :  { %p970_p13 = scmp.ne.s32.totalorder %s58_s15, %s969_s1  ;;  %p975_p1 = scmp.lt.s32.totalorder %s969_s1, %s969_s1 }
  0x3f   :  { %p976_p2 = por %p975_p1, %p974_p0 }
  0x41   :  { %p977_p3 = pnand %p976_p2, %p970_p13 }
  0x43   :  { %980 = shalt.err (!%p977_p3)
}
  0x44   :  { %63 = dma.hbm_to_vmem [thread:$0]  %s1236_s4, 512, %s58_s15, [#allocation9], %s1038_s0, %s1038_s0, %s1039_s27  }
  0x45   :  { %1025 = dma.done.wait [#allocation3], 128  }
  0x46   :  { %1026 = vsyncadd [#allocation3], 4294967168 }
  0x47   :  { %1027 = dma.done.wait [#allocation6], 640  }
  0x48   :  { %1028 = vsyncadd [#allocation6], 4294966656 }
  0x49   :  { %1029 = dma.done.wait [#allocation9], 512  }
  0x4a   :  { %1030 = vsyncadd [#allocation9], 4294966784  ;;  %v1041_v0 = vmov 0.0   ;;  %vm1042_vm0 = vmmov 0   ;;  %vm88_vm1 = vcmask 261120   ;;  %v80_v1 = vld [vmem:[#allocation7] sm:$0xff] }
  0x4b   :  { %843 = vmatprep.subr.mxu0 %v1041_v0  ;;  %848 = vmatprep.subr.mxu1 %v1041_v0  ;;  %v165_v2 = vld [vmem:[#allocation8] sm:$0xff]  ;;  %v78_v3 = vld [vmem:[#allocation2] sm:$0xff]  ;;  %v79_v4 = vld [vmem:[#allocation5] sm:$0xff]  ;;  %vm249_vm2 = vcmask 64512   ;;  %s1043_s17 = smov [#allocation10]   ;;  %s1044_s19 = smov [#allocation11]  }
  0x4c   :  { %845 = vmatprep.mubr.msk.f32.mxu0 %vm1042_vm0, %v1041_v0  ;;  %850 = vmatprep.mubr.msk.f32.mxu1 %vm1042_vm0, %v1041_v0  ;;  %v253_v5 = vld [vmem:[#allocation7 + $0x8] sm:$0xff]  ;;  %v423_v7 = vld [vmem:[#allocation7 + $0x10] sm:$0xff]  ;;  %v593_v9 = vld [vmem:[#allocation7 + $0x18] sm:$0xff]  ;;  %s767_s18 = sshll.u32 %s1043_s17, 4  ;;  %s779_s20 = sshll.u32 %s1044_s19, 4  ;;  %s768_s18 = int_to_ptr.vmem [resolvable:$true] %s767_s18  ;;  %s1193_s20 = int_to_ptr.vmem [resolvable:$true] %s779_s20 }
  0x4d   :  { %844 = vmatpush3.xpose.msk.msra.mxu0 %vm88_vm1, %v80_v1  ;;  %849 = vmatpush3.xpose.msk.msra.mxu1 %vm88_vm1, %v165_v2  ;;  %v336_v6 = vld [vmem:[#allocation8 + $0x8] sm:$0xff]  ;;  %v506_v8 = vld [vmem:[#allocation8 + $0x10] sm:$0xff]  ;;  %v676_v10 = vld [vmem:[#allocation8 + $0x18] sm:$0xff]  ;;  %p986_p5 = scmp.lt.s32.totalorder %s768_s18, %s768_s18 }
  0x4e   :  { %853 = vmatprep.subr.mxu0 %v1041_v0  ;;  %858 = vmatprep.subr.mxu1 %v1041_v0  ;;  %v797_v11 = vld [vmem:[%s1235_s3] ss:$0 sm:$0xff]  ;;  %v804_v19 = vld [vmem:[%s1235_s3 + $0x1] ss:$0 sm:$0xff]  ;;  %v812_v27 = vld [vmem:[%s1235_s3 + $0x2] ss:$0 sm:$0xff] }
  0x4f   :  { %v800_v12 = vld [vmem:[%s1237_s5] ss:$0 sm:$0xff]  ;;  %v808_v20 = vld [vmem:[%s1237_s5 + $0x1] ss:$0 sm:$0xff]  ;;  %v816_v28 = vld [vmem:[%s1237_s5 + $0x2] ss:$0 sm:$0xff] }
  0x50   :  { %846 = vmatmul.mubr.msk.f32.vlgmr.msra.gmra.mrb[0].mxu0 %vm88_vm1, %v78_v3  ;;  %851 = vmatmul.mubr.msk.f32.vlgmr.msra.gmra.mrb[0].mxu1 %vm88_vm1, %v79_v4  ;;  %v820_v35 = vld [vmem:[%s1235_s3 + $0x3] ss:$0 sm:$0xff]  ;;  %s981_s3 = scalar_lea.vmem %s768_s18, 512 }
  0x51   :  { %854 = vmatpush3.xpose.msk.msra.mxu0 %vm88_vm1, %v253_v5  ;;  %859 = vmatpush3.xpose.msk.msra.mxu1 %vm88_vm1, %v336_v6  ;;  %v824_v36 = vld [vmem:[%s1237_s5 + $0x3] ss:$0 sm:$0xff]  ;;  %p982_p4 = scmp.ne.s32.totalorder %s768_s18, %s981_s3  ;;  %p987_p6 = scmp.lt.s32.totalorder %s981_s3, %s981_s3 }
  0x52   :  { %855 = vmatprep.mubr.msk.f32.mxu0 %vm1042_vm0, %v1041_v0  ;;  %860 = vmatprep.mubr.msk.f32.mxu1 %vm1042_vm0, %v1041_v0 }
  0x53   :  { %863 = vmatprep.subr.mxu0 %v1041_v0  ;;  %868 = vmatprep.subr.mxu1 %v1041_v0  ;;  %p988_p7 = por %p987_p6, %p986_p5 }
  0x54   :  { %856 = vmatmul.mubr.msk.f32.vlgmr.msra.gmra.mrb[2].mxu0 %vm88_vm1, %v78_v3  ;;  %861 = vmatmul.mubr.msk.f32.vlgmr.msra.gmra.mrb[2].mxu1 %vm88_vm1, %v79_v4 }
  0x55   :  { %864 = vmatpush3.xpose.msk.msra.mxu0 %vm88_vm1, %v423_v7  ;;  %869 = vmatpush3.xpose.msk.msra.mxu1 %vm88_vm1, %v506_v8  ;;  %p989_p8 = pnand %p988_p7, %p982_p4 }
  0x56   :  { %865 = vmatprep.mubr.msk.f32.mxu0 %vm1042_vm0, %v1041_v0  ;;  %870 = vmatprep.mubr.msk.f32.mxu1 %vm1042_vm0, %v1041_v0 }
  0x57   :  { %873 = vmatprep.subr.mxu0 %v1041_v0  ;;  %878 = vmatprep.subr.mxu1 %v1041_v0 }
  0x58   :  { %866 = vmatmul.mubr.msk.f32.vlgmr.msra.gmra.mrb[4].mxu0 %vm88_vm1, %v78_v3  ;;  %871 = vmatmul.mubr.msk.f32.vlgmr.msra.gmra.mrb[4].mxu1 %vm88_vm1, %v79_v4 }
  0x59   :  { %874 = vmatpush3.xpose.msk.msra.mxu0 %vm88_vm1, %v593_v9  ;;  %879 = vmatpush3.xpose.msk.msra.mxu1 %vm88_vm1, %v676_v10 }
  0x5a   :  { %875 = vmatprep.mubr.msk.f32.mxu0 %vm1042_vm0, %v1041_v0  ;;  %880 = vmatprep.mubr.msk.f32.mxu1 %vm1042_vm0, %v1041_v0 }
  0x5c   :  { %876 = vmatmul.mubr.msk.f32.vlgmr.msra.gmra.mrb[6].mxu0 %vm88_vm1, %v78_v3  ;;  %881 = vmatmul.mubr.msk.f32.vlgmr.msra.gmra.mrb[6].mxu1 %vm88_vm1, %v79_v4 }
 0x123   :  { %v161_v13 = vpop.f32.mrb[0].mxu0  ;;  %v245_v14 = vpop.f32.mrb[0].mxu1 }
 0x124   :  { %v162_v15 = vadd.f32 %v797_v11, %v161_v13  ;;  %v246_v16 = vadd.f32 %v800_v12, %v245_v14  ;;  %v847_v17 = vpop.f32.mrb[1].mxu0  ;;  %v852_v18 = vpop.f32.mrb[1].mxu1 }
 0x126   :  { %250 = vst.msk [vmem:[#allocation10] sm:$0xff] %vm249_vm2, %v162_v15  ;;  %251 = vst.msk [vmem:[#allocation11] sm:$0xff] %vm249_vm2, %v246_v16 }
 0x127   :  { %v331_v21 = vpop.f32.mrb[2].mxu0  ;;  %v414_v22 = vpop.f32.mrb[2].mxu1 }
 0x128   :  { %v332_v23 = vadd.f32 %v804_v19, %v331_v21  ;;  %v415_v24 = vadd.f32 %v808_v20, %v414_v22  ;;  %v857_v25 = vpop.f32.mrb[3].mxu0  ;;  %v862_v26 = vpop.f32.mrb[3].mxu1 }
 0x12a   :  { %419 = vst.msk [vmem:[#allocation10 + $0x8] sm:$0xff] %vm249_vm2, %v332_v23  ;;  %421 = vst.msk [vmem:[#allocation11 + $0x8] sm:$0xff] %vm249_vm2, %v415_v24 }
 0x12b   :  { %v501_v29 = vpop.f32.mrb[4].mxu0  ;;  %v584_v30 = vpop.f32.mrb[4].mxu1 }
 0x12c   :  { %v502_v31 = vadd.f32 %v812_v27, %v501_v29  ;;  %v585_v32 = vadd.f32 %v816_v28, %v584_v30  ;;  %v867_v33 = vpop.f32.mrb[5].mxu0  ;;  %v872_v34 = vpop.f32.mrb[5].mxu1 }
 0x12e   :  { %589 = vst.msk [vmem:[#allocation10 + $0x10] sm:$0xff] %vm249_vm2, %v502_v31  ;;  %591 = vst.msk [vmem:[#allocation11 + $0x10] sm:$0xff] %vm249_vm2, %v585_v32 }
 0x12f   :  { %v671_v37 = vpop.f32.mrb[6].mxu0  ;;  %v754_v38 = vpop.f32.mrb[6].mxu1 }
 0x130   :  { %v672_v39 = vadd.f32 %v820_v35, %v671_v37  ;;  %v755_v40 = vadd.f32 %v824_v36, %v754_v38  ;;  %v877_v41 = vpop.f32.mrb[7].mxu0  ;;  %v882_v42 = vpop.f32.mrb[7].mxu1 }
 0x132   :  { %759 = vst.msk [vmem:[#allocation10 + $0x18] sm:$0xff] %vm249_vm2, %v672_v39  ;;  %761 = vst.msk [vmem:[#allocation11 + $0x18] sm:$0xff] %vm249_vm2, %v755_v40 }
 0x133   :  { %992 = shalt.err (!%p989_p8)
}
 0x134   :  { %s993_s22 = scalar_lea.hbm %s1238_s6, 512 }
 0x135   :  { %p994_p9 = scmp.ne.s32.totalorder %s1238_s6, %s993_s22  ;;  %p997_p10 = scmp.lt.u32.totalorder %s993_s22, %s1238_s6 }
 0x137   :  { %p999_p11 = pnand %p997_p10, %p994_p9 }
 0x139   :  { %1002 = shalt.err (!%p999_p11)
}
 0x13a   :  { %773 = dma.vmem_to_hbm [thread:$0]  %s768_s18, 512, %s1238_s6, [#allocation4], %s1038_s0, %s1038_s0, %s1039_s27  }
 0x13b   :  { %s1003_s26 = scalar_lea.vmem %s1193_s20, 512  ;;  %p1008_p13 = scmp.lt.s32.totalorder %s1193_s20, %s1193_s20 }
 0x13c   :  { %p1004_p12 = scmp.ne.s32.totalorder %s1193_s20, %s1003_s26  ;;  %p1009_p0 = scmp.lt.s32.totalorder %s1003_s26, %s1003_s26 }
 0x13e   :  { %p1010_p1 = por %p1009_p0, %p1008_p13 }
 0x140   :  { %p1011_p2 = pnand %p1010_p1, %p1004_p12 }
 0x142   :  { %1014 = shalt.err (!%p1011_p2)
}
 0x143   :  { %s1015_s30 = scalar_lea.hbm %s1239_s7, 512 }
 0x144   :  { %p1016_p3 = scmp.ne.s32.totalorder %s1239_s7, %s1015_s30  ;;  %p1019_p4 = scmp.lt.u32.totalorder %s1015_s30, %s1239_s7 }
 0x146   :  { %p1021_p5 = pnand %p1019_p4, %p1016_p3 }
 0x148   :  { %1024 = shalt.err (!%p1021_p5)
}
 0x149   :  { %785 = dma.vmem_to_hbm [thread:$0]  %s1193_s20, 512, %s1239_s7, [#allocation12], %s1038_s0, %s1038_s0, %s1039_s27  }
 0x14a   :  { %1031 = dma.done.wait [#allocation4], 512  }
 0x14b   :  { %1032 = vsyncadd [#allocation4], 4294966784 }
 0x14c   :  { %1033 = dma.done.wait [#allocation12], 512  }
 0x14d   :  { %1034 = vsyncadd [#allocation12], 4294966784 }
 0x14e   :  { %792 = vsyncpa [#allocation3], 1 }
 0x14f   :  { %793 = vsyncpa [#allocation6], 1 }
 0x150   :  { %794 = vsyncpa [#allocation9], 1 }
 0x151   :  { %795 = vsyncpa [#allocation4], 1 }
 0x152   :  { %796 = vsyncpa [#allocation12], 1 }

</bundles_post_ra>
